<compile_context>
chip_gen: v6e
topology: v6e:2x2x1
jax: 0.10.0
libtpu: 0.0.40
codegen_flags: <defaults>
</compile_context>

<pallas_src>
import numpy as np
import jax
import jax.numpy as jnp
from jax import lax
from jax.experimental import pallas as pl
from jax.experimental.pallas import tpu as pltpu

# ----------------------------- model dims -----------------------------------
B = 2               # semantic batch of the example
IMG = 16            # full image is IMG x IMG, 1 channel (NCHW)
LOW = IMG // 2      # low-res view is LOW x LOW (2x2 avg pool)        -> 8
QUAD = IMG // 2     # each quadrant is QUAD x QUAD                    -> 8
HALF_LOW = LOW // 2                                                  # 4
D_LOW = LOW * LOW           # 64  flattened low-res features
D_QUAD = QUAD * QUAD        # 64  flattened quadrant features
N_QUAD = 4
HID = 32                    # embedding size for both branches
N_CLASSES = 10
D_SLAB = N_QUAD * D_QUAD    # 256 packed activation lanes (4 quadrants)
W_LANES = 128

# packed lane layout (shared by W1 result, W2 result and the output slab)
L_LR = 0                    # low-res embedding pre-act : lanes [0, 32)
L_FOC = HID                 # focus embedding pre-act   : lanes [32, 64)
L_LOGP = 2 * HID            # core logits / log-probs   : lanes [64, 74)
L_ATT = 96                  # attention logits / weights: lanes [96, 100)


# ----------------------------- Pallas kernel --------------------------------
def fullnet_kernel(x_ref, w1_ref, r_ref, w2_ref, b_ref, out_ref):
    """One batch tile of the full forward pass.

    x_ref  : [BT, 256] bf16  4 flattened quadrants (q00|q01|q10|q11)
    w1_ref : [256, 128] bf16 pool-folded w_lr' | 4x-replicated w_foc | pool-folded w_att'
    r_ref  : [128, 256] f32  0/1 matrix replicating att lanes over 64-lane quadrant groups
    w2_ref : [128, 128] bf16 w_core mapped to lanes [64,74), rows [64,128) zero
    b_ref  : [2, 128]  f32   row0 = b_lr|b_foc|b_att lanes, row1 = b_core lanes
    out_ref: [BT, 128] f32   lanes [64,74)=log-probs, [96,100)=attention weights
    """
    x = x_ref[...]                                   # [BT,256] bf16
    w1 = w1_ref[...]                                 # [256,128] bf16
    r = r_ref[...]                                   # [128,256] f32
    w2 = w2_ref[...]                                 # [128,128] bf16
    b_all = b_ref[...]                               # [2,128]  f32
    b1 = b_all[0:1, :]
    b2 = b_all[1:2, :]
    bt = x.shape[0]

    lane = lax.broadcasted_iota(jnp.int32, (bt, W_LANES), 1)
    neg = jnp.float32(-1e30)

    # --- matmul 1: raw quadrants @ W1 (avg-pool folded into the weights) -----
    #     lanes [0,32) = low-res pre-act, [96,100) = attention logits
    xw = jnp.dot(x, w1, preferred_element_type=jnp.float32) + b1        # [BT,128] f32

    # --- AttentionBox softmax over lanes [96,100), full-width masked ---------
    att_mask = (lane >= L_ATT) & (lane < L_ATT + N_QUAD)
    z = jnp.where(att_mask, xw, neg)
    m = jnp.max(z, axis=-1, keepdims=True)
    e = jnp.exp(z - m)                                                   # 0 off-mask
    att_wide = e * pl.reciprocal(jnp.sum(e, axis=-1, keepdims=True), approx=True)

    # --- low-res embedding: full-width ReLU (only lanes [0,32) consumed) -----
    h_lr = jnp.maximum(xw, 0.0)                                          # [BT,128]

    # --- soft-attended quadrants: replicate attention over 64-lane quadrant
    #     groups with one tiny MXU pass, then one full-width VPU multiply -----
    att_rep = jnp.dot(att_wide, r, preferred_element_type=jnp.float32)  # [BT,256] f32
    weighted = (att_rep * x.astype(jnp.float32)).astype(jnp.bfloat16)   # [BT,256] bf16

    # --- matmul 2: weighted quadrants @ W1 (w_foc replicated 4x along rows,
    #     so lanes [32,64) are the focus pre-activation; K=256) --------------
    fw = jnp.dot(weighted, w1, preferred_element_type=jnp.float32) + b1
    h_foc = jnp.maximum(fw, 0.0)                                         # [BT,128]

    # --- CoreAndProposalLayer: concat(lr_emb, focus_emb) without slicing -----
    #     lanes [0,32)=lr_emb, [32,64)=focus_emb, rest killed by zero W2 rows
    cat_wide = jnp.where(lane < HID, h_lr, h_foc)                        # [BT,128]
    cw = jnp.dot(cat_wide.astype(jnp.bfloat16), w2,
                 preferred_element_type=jnp.float32) + b2                # logits at [64,74)

    # --- log_softmax over lanes [64,74), full-width masked --------------------
    logp_mask = (lane >= L_LOGP) & (lane < L_LOGP + N_CLASSES)
    zc = jnp.where(logp_mask, cw, neg)
    m2 = jnp.max(zc, axis=-1, keepdims=True)
    lse = m2 + jnp.log(jnp.sum(jnp.exp(zc - m2), axis=-1, keepdims=True))
    logp_wide = cw - lse                                                 # valid at [64,74)

    # --- single lane-dense output store (lane-mask select, no concatenate) ----
    out_ref[...] = jnp.where(lane < L_ATT, logp_wide, att_wide)


# ----------------------------- parameters ------------------------------------
def init_params(key):
    """Deterministic parameter init (Linear-style 1/sqrt(fan_in) scaling)."""
    ks = jax.random.split(key, 4)

    def lin(k, fan_in, fan_out):
        s = 1.0 / jnp.sqrt(jnp.float32(fan_in))
        w = jax.random.uniform(k, (fan_in, fan_out), jnp.float32, -s, s)
        b = jnp.zeros((1, fan_out), jnp.float32)
        return w, b

    w_att, b_att = lin(ks[0], D_LOW, N_QUAD)
    w_foc, b_foc = lin(ks[1], D_QUAD, HID)
    w_lr, b_lr = lin(ks[2], D_LOW, HID)
    w_core, b_core = lin(ks[3], 2 * HID, N_CLASSES)   # acts on concat(lr, focus)
    return dict(w_att=w_att, b_att=b_att, w_foc=w_foc, b_foc=b_foc,
                w_lr=w_lr, b_lr=b_lr, w_core=w_core, b_core=b_core)


def _pool_matrix():
    """[256,64] matrix P with  lowres_flat = quadrant_slab @ P  (2x2 avg pool)."""
    p = np.zeros((D_SLAB, D_LOW), np.float32)
    for i in range(LOW):
        for j in range(LOW):
            q = (i >= HALF_LOW) * 2 + (j >= HALF_LOW)       # quadrant index
            li, lj = 2 * (i % HALF_LOW), 2 * (j % HALF_LOW)  # local pixel in quadrant
            for di in range(2):
                for dj in range(2):
                    p[q * D_QUAD + (li + di) * QUAD + (lj + dj), i * LOW + j] = 0.25
    return jnp.asarray(p)


def pack_params(params):
    """Fold pooling / replication into the weights and pack the lane slabs."""
    pool = _pool_matrix()                                    # [256, 64]

    # W1: RHS shared by matmul 1 (raw quadrants) and matmul 2 (weighted quads)
    w1 = jnp.zeros((D_SLAB, W_LANES), jnp.float32)
    w1 = w1.at[:, L_LR:L_LR + HID].set(pool @ params["w_lr"])             # pool-folded
    w1 = w1.at[:, L_FOC:L_FOC + HID].set(jnp.tile(params["w_foc"], (N_QUAD, 1)))
    w1 = w1.at[:, L_ATT:L_ATT + N_QUAD].set(pool @ params["w_att"])       # pool-folded

    # R: replicate attention weight q over quadrant-q's 64 lanes
    r = jnp.zeros((W_LANES, D_SLAB), jnp.float32)
    for q in range(N_QUAD):
        r = r.at[L_ATT + q, q * D_QUAD:(q + 1) * D_QUAD].set(1.0)

    # W2: core weights; zero rows kill the garbage lanes of cat_wide
    w2 = jnp.zeros((W_LANES, W_LANES), jnp.float32)
    w2 = w2.at[:HID, L_LOGP:L_LOGP + N_CLASSES].set(params["w_core"][:HID])
    w2 = w2.at[HID:2 * HID, L_LOGP:L_LOGP + N_CLASSES].set(params["w_core"][HID:])

    # biases: row 0 for matmuls 1/2, row 1 for the core matmul
    b = jnp.zeros((2, W_LANES), jnp.float32)
    b = b.at[0, L_LR:L_LR + HID].set(params["b_lr"][0])
    b = b.at[0, L_FOC:L_FOC + HID].set(params["b_foc"][0])
    b = b.at[0, L_ATT:L_ATT + N_QUAD].set(params["b_att"][0])
    b = b.at[1, L_LOGP:L_LOGP + N_CLASSES].set(params["b_core"][0])

    return w1.astype(jnp.bfloat16), r, w2.astype(jnp.bfloat16), b


# ----------------------------- host-side glue --------------------------------
def _images_packed(images_nchw):
    """Images.focusView(): the 4 flattened quadrants packed into [B,256] bf16."""
    b = images_nchw.shape[0]
    img = images_nchw[:, 0, :, :]                                  # [B, 16, 16]
    q00 = img[:, :QUAD, :QUAD].reshape(b, D_QUAD)
    q01 = img[:, :QUAD, QUAD:].reshape(b, D_QUAD)
    q10 = img[:, QUAD:, :QUAD].reshape(b, D_QUAD)
    q11 = img[:, QUAD:, QUAD:].reshape(b, D_QUAD)
    return jnp.concatenate([q00, q01, q10, q11], axis=-1).astype(jnp.bfloat16)


def _round_up(v, m):
    return ((v + m - 1) // m) * m


def _pick_tile(b_real):
    """Large batch tiles (amortize ~0.35us/step), >=2 tiles when possible (megacore)."""
    bt = min(1024, _round_up(b_real, 8))
    if b_real >= 16:                       # keep >=2 grid steps so both TCs get work
        bt = min(bt, _round_up(_round_up(b_real, 8) // 2, 8))
    return max(bt, 8)


# ----------------------------- forward ----------------------------------------
@jax.jit
def fullnet_forward(images_nchw, w1_packed, r_packed, w2_packed, b_packed):
    x = _images_packed(images_nchw)                                # [B, 256] bf16
    b_real = x.shape[0]

    bt = _pick_tile(b_real)
    b_pad = _round_up(b_real, bt)
    if b_pad != b_real:
        x = jnp.pad(x, ((0, b_pad - b_real), (0, 0)))

    # NOTE: output slab stays f32 (14 useful lanes of 128); if profiling shows a
    # write-bound regime on v5e it could be emitted as bf16 or row-packed.
    out = pl.pallas_call(
        fullnet_kernel,
        out_shape=jax.ShapeDtypeStruct((b_pad, W_LANES), jnp.float32),
        grid_spec=pltpu.PrefetchScalarGridSpec(
            num_scalar_prefetch=0,
            grid=(b_pad // bt,),
            in_specs=[
                pl.BlockSpec((bt, D_SLAB), lambda i: (i, 0)),         # activations
                pl.BlockSpec((D_SLAB, W_LANES), lambda i: (0, 0)),    # W1 (pool/rep folded)
                pl.BlockSpec((W_LANES, D_SLAB), lambda i: (0, 0)),    # R replication
                pl.BlockSpec((W_LANES, W_LANES), lambda i: (0, 0)),   # W2 core
                pl.BlockSpec((2, W_LANES), lambda i: (0, 0)),         # biases
            ],
            out_specs=pl.BlockSpec((bt, W_LANES), lambda i: (i, 0)),
        ),
        compiler_params=pltpu.CompilerParams(
            dimension_semantics=("parallel",)),                       # megacore-friendly
    )(x, w1_packed, r_packed, w2_packed, b_packed)

    logp = out[:b_real, L_LOGP:L_LOGP + N_CLASSES]   # proposal_dist (log-probs)
    att = out[:b_real, L_ATT:L_ATT + N_QUAD]         # getAttentionSummary()
    return logp, att


# ----------------------------- reference (pure JAX, f32) ----------------------
def fullnet_reference(images_nchw, params):
    b = images_nchw.shape[0]
    img = images_nchw[:, 0, :, :]
    low = img.reshape(b, LOW, 2, LOW, 2).mean(axis=(2, 4)).reshape(b, D_LOW)
    quads = jnp.stack(
        [img[:, :QUAD, :QUAD].reshape(b, D_QUAD),
         img[:, :QUAD, QUAD:].reshape(b, D_QUAD),
         img[:, QUAD:, :QUAD].reshape(b, D_QUAD),
         img[:, QUAD:, QUAD:].reshape(b, D_QUAD)], axis=1)            # [B,4,64]
    att_logits = low @ params["w_att"] + params["b_att"]
    att = jax.nn.softmax(att_logits, axis=-1)
    focus_in = jnp.einsum("bq,bqd->bd", att, quads)
    focus_emb = jax.nn.relu(focus_in @ params["w_foc"] + params["b_foc"])
    lr_emb = jax.nn.relu(low @ params["w_lr"] + params["b_lr"])
    logits = (jnp.concatenate([lr_emb, focus_emb], axis=-1) @ params["w_core"]
              + params["b_core"])
    return jax.nn.log_softmax(logits, axis=-1), att


# ----------------------------- main -------------------------------------------
if __name__ == "__main__":
    key = jax.random.PRNGKey(0)
    k_img, k_par = jax.random.split(key)

    # layout: NCHW [B, 1, 16, 16] synthetic "MNIST-quadrant" images
    images = jax.random.uniform(k_img, (B, 1, IMG, IMG), jnp.float32)
    params = init_params(k_par)
    w1_packed, r_packed, w2_packed, b_packed = pack_params(params)  # once, off hot path

    logp, att = fullnet_forward(images, w1_packed, r_packed, w2_packed, b_packed)
    jax.block_until_ready((logp, att))

    ref_logp, ref_att = fullnet_reference(images, params)
    assert logp.shape == (B, N_CLASSES) and att.shape == (B, N_QUAD)
    # bf16 matmul inputs => relaxed tolerance vs the f32 reference
    assert jnp.allclose(logp, ref_logp, atol=2e-2, rtol=2e-2)
    assert jnp.allclose(att, ref_att, atol=2e-2, rtol=2e-2)
    # log-probs should normalize per row (log-softmax itself runs in f32)
    assert jnp.allclose(jnp.sum(jnp.exp(logp), axis=-1), 1.0, atol=1e-3)

    print("KERNEL_OK")
</pallas_src>

<mosaic_0001>
module attributes {stable_mosaic.version = 11 : i64} {
  func.func @fullnet_kernel(%arg0: i32, %arg1: memref<8x256xbf16, #tpu.memory_space<vmem>>, %arg2: memref<256x128xbf16, #tpu.memory_space<vmem>>, %arg3: memref<128x256xf32, #tpu.memory_space<vmem>>, %arg4: memref<128x128xbf16, #tpu.memory_space<vmem>>, %arg5: memref<2x128xf32, #tpu.memory_space<vmem>>, %arg6: memref<8x128xf32, #tpu.memory_space<vmem>>) attributes {dimension_semantics = [#tpu.dimension_semantics<parallel>], iteration_bounds = array<i64: 1>, scalar_prefetch = 0 : i64, scratch_operands = 0 : i64, tpu.core_type = #tpu.core_type<tc>, window_params = [{transform_indices = @transform_0, window_bounds = array<i64: 8, 256>}, {pipeline_mode = #tpu.pipeline_mode<synchronous>, transform_indices = @transform_1, window_bounds = array<i64: 256, 128>}, {pipeline_mode = #tpu.pipeline_mode<synchronous>, transform_indices = @transform_2, window_bounds = array<i64: 128, 256>}, {pipeline_mode = #tpu.pipeline_mode<synchronous>, transform_indices = @transform_3, window_bounds = array<i64: 128, 128>}, {pipeline_mode = #tpu.pipeline_mode<synchronous>, transform_indices = @transform_4, window_bounds = array<i64: 2, 128>}, {transform_indices = @transform_5, window_bounds = array<i64: 8, 128>}]} {
    %c0 = arith.constant 0 : index
    %c0_0 = arith.constant 0 : index
    %0 = vector.load %arg1[%c0, %c0_0] : memref<8x256xbf16, #tpu.memory_space<vmem>>, vector<8x256xbf16>
    %c0_1 = arith.constant 0 : index
    %c0_2 = arith.constant 0 : index
    %1 = vector.load %arg2[%c0_1, %c0_2] : memref<256x128xbf16, #tpu.memory_space<vmem>>, vector<256x128xbf16>
    %c0_3 = arith.constant 0 : index
    %c0_4 = arith.constant 0 : index
    %2 = vector.load %arg3[%c0_3, %c0_4] : memref<128x256xf32, #tpu.memory_space<vmem>>, vector<128x256xf32>
    %c0_5 = arith.constant 0 : index
    %c0_6 = arith.constant 0 : index
    %3 = vector.load %arg4[%c0_5, %c0_6] : memref<128x128xbf16, #tpu.memory_space<vmem>>, vector<128x128xbf16>
    %c0_7 = arith.constant 0 : index
    %c0_8 = arith.constant 0 : index
    %4 = vector.load %arg5[%c0_7, %c0_8] : memref<2x128xf32, #tpu.memory_space<vmem>>, vector<2x128xf32>
    %5 = vector.extract_strided_slice %4 {offsets = [0, 0], sizes = [1, 128], strides = [1, 1]} : vector<2x128xf32> to vector<1x128xf32>
    %6 = vector.extract_strided_slice %4 {offsets = [1, 0], sizes = [1, 128], strides = [1, 1]} : vector<2x128xf32> to vector<1x128xf32>
    %7 = tpu.iota {dimensions = array<i32: 1>} : vector<8x128xi32>
    %cst = arith.constant dense<0.000000e+00> : vector<8x128xf32>
    %8 = tpu.matmul %0, %1, %cst {dimension_numbers = #tpu.dot_dimension_numbers<[1], [0], [0], [1], [0, 0, 1, 1], [], []>} : vector<8x256xbf16>, vector<256x128xbf16>, vector<8x128xf32> -> vector<8x128xf32>
    %9 = vector.broadcast %5 : vector<1x128xf32> to vector<8x128xf32>
    %10 = arith.addf %8, %9 : vector<8x128xf32>
    %c96_i32 = arith.constant 96 : i32
    %11 = vector.broadcast %c96_i32 : i32 to vector<8x128xi32>
    %12 = arith.cmpi sge, %7, %11 : vector<8x128xi32>
    %c100_i32 = arith.constant 100 : i32
    %13 = vector.broadcast %c100_i32 : i32 to vector<8x128xi32>
    %14 = arith.cmpi slt, %7, %13 : vector<8x128xi32>
    %15 = arith.andi %12, %14 : vector<8x128xi1>
    %cst_9 = arith.constant -1.000000e+30 : f32
    %16 = vector.broadcast %cst_9 : f32 to vector<8x128xf32>
    %17 = arith.select %15, %10, %16 : vector<8x128xi1>, vector<8x128xf32>
    %cst_10 = arith.constant dense<0xFF800000> : vector<8xf32>
    %18 = vector.multi_reduction <maximumf>, %17, %cst_10 [1] : vector<8x128xf32> to vector<8xf32>
    %19 = vector.shape_cast %18 : vector<8xf32> to vector<8x1xf32>
    %20 = vector.broadcast %19 : vector<8x1xf32> to vector<8x128xf32>
    %21 = arith.subf %17, %20 : vector<8x128xf32>
    %22 = math.exp %21 : vector<8x128xf32>
    %cst_11 = arith.constant dense<0.000000e+00> : vector<8xf32>
    %23 = vector.multi_reduction <add>, %22, %cst_11 [1] : vector<8x128xf32> to vector<8xf32>
    %24 = vector.shape_cast %23 : vector<8xf32> to vector<8x1xf32>
    %25 = tpu.reciprocal %24 {approx = true} : vector<8x1xf32> -> vector<8x1xf32>
    %26 = vector.broadcast %25 : vector<8x1xf32> to vector<8x128xf32>
    %27 = arith.mulf %22, %26 : vector<8x128xf32>
    %cst_12 = arith.constant 0.000000e+00 : f32
    %28 = vector.broadcast %cst_12 : f32 to vector<8x128xf32>
    %29 = arith.maximumf %10, %28 : vector<8x128xf32>
    %cst_13 = arith.constant dense<0.000000e+00> : vector<8x256xf32>
    %30 = tpu.matmul %27, %2, %cst_13 {dimension_numbers = #tpu.dot_dimension_numbers<[1], [0], [0], [1], [0, 0, 1, 1], [], []>} : vector<8x128xf32>, vector<128x256xf32>, vector<8x256xf32> -> vector<8x256xf32>
    %31 = arith.extf %0 : vector<8x256xbf16> to vector<8x256xf32>
    %32 = arith.mulf %30, %31 : vector<8x256xf32>
    %33 = arith.truncf %32 : vector<8x256xf32> to vector<8x256xbf16>
    %cst_14 = arith.constant dense<0.000000e+00> : vector<8x128xf32>
    %34 = tpu.matmul %33, %1, %cst_14 {dimension_numbers = #tpu.dot_dimension_numbers<[1], [0], [0], [1], [0, 0, 1, 1], [], []>} : vector<8x256xbf16>, vector<256x128xbf16>, vector<8x128xf32> -> vector<8x128xf32>
    %35 = vector.broadcast %5 : vector<1x128xf32> to vector<8x128xf32>
    %36 = arith.addf %34, %35 : vector<8x128xf32>
    %cst_15 = arith.constant 0.000000e+00 : f32
    %37 = vector.broadcast %cst_15 : f32 to vector<8x128xf32>
    %38 = arith.maximumf %36, %37 : vector<8x128xf32>
    %c32_i32 = arith.constant 32 : i32
    %39 = vector.broadcast %c32_i32 : i32 to vector<8x128xi32>
    %40 = arith.cmpi slt, %7, %39 : vector<8x128xi32>
    %41 = arith.select %40, %29, %38 : vector<8x128xi1>, vector<8x128xf32>
    %42 = arith.truncf %41 : vector<8x128xf32> to vector<8x128xbf16>
    %cst_16 = arith.constant dense<0.000000e+00> : vector<8x128xf32>
    %43 = tpu.matmul %42, %3, %cst_16 {dimension_numbers = #tpu.dot_dimension_numbers<[1], [0], [0], [1], [0, 0, 1, 1], [], []>} : vector<8x128xbf16>, vector<128x128xbf16>, vector<8x128xf32> -> vector<8x128xf32>
    %44 = vector.broadcast %6 : vector<1x128xf32> to vector<8x128xf32>
    %45 = arith.addf %43, %44 : vector<8x128xf32>
    %c64_i32 = arith.constant 64 : i32
    %46 = vector.broadcast %c64_i32 : i32 to vector<8x128xi32>
    %47 = arith.cmpi sge, %7, %46 : vector<8x128xi32>
    %c74_i32 = arith.constant 74 : i32
    %48 = vector.broadcast %c74_i32 : i32 to vector<8x128xi32>
    %49 = arith.cmpi slt, %7, %48 : vector<8x128xi32>
    %50 = arith.andi %47, %49 : vector<8x128xi1>
    %cst_17 = arith.constant -1.000000e+30 : f32
    %51 = vector.broadcast %cst_17 : f32 to vector<8x128xf32>
    %52 = arith.select %50, %45, %51 : vector<8x128xi1>, vector<8x128xf32>
    %cst_18 = arith.constant dense<0xFF800000> : vector<8xf32>
    %53 = vector.multi_reduction <maximumf>, %52, %cst_18 [1] : vector<8x128xf32> to vector<8xf32>
    %54 = vector.shape_cast %53 : vector<8xf32> to vector<8x1xf32>
    %55 = vector.broadcast %54 : vector<8x1xf32> to vector<8x128xf32>
    %56 = arith.subf %52, %55 : vector<8x128xf32>
    %57 = math.exp %56 : vector<8x128xf32>
    %cst_19 = arith.constant dense<0.000000e+00> : vector<8xf32>
    %58 = vector.multi_reduction <add>, %57, %cst_19 [1] : vector<8x128xf32> to vector<8xf32>
    %59 = vector.shape_cast %58 : vector<8xf32> to vector<8x1xf32>
    %60 = math.log %59 : vector<8x1xf32>
    %61 = arith.addf %54, %60 : vector<8x1xf32>
    %62 = vector.broadcast %61 : vector<8x1xf32> to vector<8x128xf32>
    %63 = arith.subf %45, %62 : vector<8x128xf32>
    %c96_i32_20 = arith.constant 96 : i32
    %64 = vector.broadcast %c96_i32_20 : i32 to vector<8x128xi32>
    %65 = arith.cmpi slt, %7, %64 : vector<8x128xi32>
    %66 = arith.select %65, %63, %27 : vector<8x128xi1>, vector<8x128xf32>
    %c0_21 = arith.constant 0 : index
    %c0_22 = arith.constant 0 : index
    %67 = vector.load %arg6[%c0_21, %c0_22] : memref<8x128xf32, #tpu.memory_space<vmem>>, vector<8x128xf32>
    tpu.vector_store %arg6[%c0_21, %c0_22], %66 {strides = array<i32>} : memref<8x128xf32, #tpu.memory_space<vmem>>, vector<8x128xf32>,
    return
  }
  func.func @transform_0(%arg0: i32) -> (i32, i32) {
    %c0_i32 = arith.constant 0 : i32
    %c0_i32_0 = arith.constant 0 : i32
    return %arg0, %c0_i32 : i32, i32
  }
  func.func @transform_1(%arg0: i32) -> (i32, i32) {
    %c0_i32 = arith.constant 0 : i32
    %c0_i32_0 = arith.constant 0 : i32
    %c0_i32_1 = arith.constant 0 : i32
    return %c0_i32, %c0_i32_0 : i32, i32
  }
  func.func @transform_2(%arg0: i32) -> (i32, i32) {
    %c0_i32 = arith.constant 0 : i32
    %c0_i32_0 = arith.constant 0 : i32
    %c0_i32_1 = arith.constant 0 : i32
    return %c0_i32, %c0_i32_0 : i32, i32
  }
  func.func @transform_3(%arg0: i32) -> (i32, i32) {
    %c0_i32 = arith.constant 0 : i32
    %c0_i32_0 = arith.constant 0 : i32
    %c0_i32_1 = arith.constant 0 : i32
    return %c0_i32, %c0_i32_0 : i32, i32
  }
  func.func @transform_4(%arg0: i32) -> (i32, i32) {
    %c0_i32 = arith.constant 0 : i32
    %c0_i32_0 = arith.constant 0 : i32
    %c0_i32_1 = arith.constant 0 : i32
    return %c0_i32, %c0_i32_0 : i32, i32
  }
  func.func @transform_5(%arg0: i32) -> (i32, i32) {
    %c0_i32 = arith.constant 0 : i32
    %c0_i32_0 = arith.constant 0 : i32
    return %arg0, %c0_i32 : i32, i32
  }
}

</mosaic_0001>

<bundles_post_ra>
// kernel: fullnet_forward.1
= control target key start
LH: loop header
LB: loop body
LE: loop exit
PB: predicated region body
PF: predicated region fallthrough
CT: control target
= control target key end

     0   :  { %10 = vsyncpa [#allocation3], 0  ;;  %s863_s0 = inlined_call_operand.vmem [shape: bf16[8,256], index: 0, kind: input, shape index: {}]   ;;  %s864_s1 = inlined_call_operand.vmem [shape: bf16[256,128], index: 1, kind: input, shape index: {}]   ;;  %s865_s2 = inlined_call_operand.hbm [shape: f32[128,256], index: 2, kind: input, shape index: {}]   ;;  %s866_s3 = inlined_call_operand.hbm [shape: bf16[128,128], index: 3, kind: input, shape index: {}]   ;;  %s867_s4 = inlined_call_operand.vmem [shape: f32[2,128], index: 4, kind: input, shape index: {}]   ;;  %s868_s5 = inlined_call_operand.vmem [shape: f32[8,128], index: 5, kind: output, shape index: {}]  }
   0x1   :  { %11 = vsyncpa [#allocation5], 0  ;;  %s716_s18 = smov [#allocation2]  }
   0x2   :  { %s21_s19 = sshll.u32 %s716_s18, 4  ;;  %s22_s19 = int_to_ptr.vmem [resolvable:$true] %s21_s19 }
   0x3   :  { %s680_s20 = scalar_lea.vmem %s22_s19, 4096  ;;  %p685_p1 = scmp.lt.s32.totalorder %s22_s19, %s22_s19 }
   0x4   :  { %p681_p0 = scmp.ne.s32.totalorder %s22_s19, %s680_s20  ;;  %p686_p2 = scmp.lt.s32.totalorder %s680_s20, %s680_s20 }
   0x6   :  { %p687_p3 = por %p686_p2, %p685_p1 }
   0x8   :  { %p688_p4 = pnand %p687_p3, %p681_p0 }
   0xa   :  { %691 = shalt.err (!%p688_p4)
}
   0xb   :  { %s717_s21 = smov 256   ;;  %s718_s22 = smov 16  }
   0xc   :  { %27 = dma.hbm_to_vmem [thread:$0]  %s865_s2, 4096, %s22_s19, [#allocation3], %s717_s21, %s717_s21, %s718_s22  }
   0xd   :  { %s719_s25 = smov [#allocation4]  }
   0xe   :  { %s33_s26 = sshll.u32 %s719_s25, 4  ;;  %s34_s26 = int_to_ptr.vmem [resolvable:$true] %s33_s26 }
   0xf   :  { %s700_s27 = scalar_lea.vmem %s34_s26, 1024  ;;  %p705_p6 = scmp.lt.s32.totalorder %s34_s26, %s34_s26 }
  0x10   :  { %p701_p5 = scmp.ne.s32.totalorder %s34_s26, %s700_s27  ;;  %p706_p7 = scmp.lt.s32.totalorder %s700_s27, %s700_s27 }
  0x12   :  { %p707_p8 = por %p706_p7, %p705_p6 }
  0x14   :  { %p708_p9 = pnand %p707_p8, %p701_p5 }
  0x16   :  { %711 = shalt.err (!%p708_p9)
}
  0x17   :  { %s720_s28 = smov 64   ;;  %s721_s29 = smov 4  }
  0x18   :  { %39 = dma.hbm_to_vmem [thread:$0]  %s866_s3, 1024, %s34_s26, [#allocation5], %s720_s28, %s720_s28, %s721_s29  }
  0x19   :  { %712 = dma.done.wait [#allocation3], 4096  }
  0x1a   :  { %713 = vsyncadd [#allocation3], 4294963200 }
  0x1b   :  { %714 = dma.done.wait [#allocation5], 1024  }
  0x1c   :  { %715 = vsyncadd [#allocation5], 4294966272  ;;  %v638_v0 = vld [vmem:[%s864_s1 + $0x78] sm:$0xff]   ;;  %v640_v2 = vld [vmem:[%s864_s1 + $0x70] sm:$0xff]   ;;  %v131_v19 = vlaneseq  ;;  %v722_v57 = vmov 0.0   ;;  %vm723_vm3 = vmmov 0  }
  0x1d   :  { %v639_v1 = vld [vmem:[%s864_s1 + $0x38] sm:$0xff]   ;;  %557 = vmatprep.subr.bf16.mxu0 %v638_v0  ;;  %v641_v3 = vld [vmem:[%s864_s1 + $0x30] sm:$0xff]   ;;  %v642_v4 = vld [vmem:[%s864_s1 + $0x68] sm:$0xff]   ;;  %358 = vmatprep.mubr.f32.mxu1 %v722_v57 }
  0x1e   :  { %558 = vmatpush3.bf16.msra.mxu0 %v639_v1  ;;  %v643_v5 = vld [vmem:[%s864_s1 + $0x28] sm:$0xff]   ;;  %v644_v6 = vld [vmem:[%s864_s1 + $0x60] sm:$0xff]   ;;  %v646_v8 = vld [vmem:[%s864_s1 + $0x58] sm:$0xff]   ;;  %v817_v20 = vshrl.u32 %v131_v19, 7  ;;  %v819_v21 = vand.u32 127, %v131_v19 }
  0x1f   :  { %559 = vmatprep.subr.bf16.mxu0 %v640_v2  ;;  %v645_v7 = vld [vmem:[%s864_s1 + $0x20] sm:$0xff]   ;;  %v647_v9 = vld [vmem:[%s864_s1 + $0x18] sm:$0xff]   ;;  %v648_v10 = vld [vmem:[%s864_s1 + $0x50] sm:$0xff]  }
  0x20   :  { %v796_v11 = vld [vmem:[%s863_s0] sm:$0xff]  ;;  %v649_v12 = vld [vmem:[%s864_s1 + $0x10] sm:$0xff]   ;;  %v650_v14 = vld [vmem:[%s864_s1 + $0x48] sm:$0xff]   ;;  %v135_v22 = vsub.s32 0, %v817_v20  ;;  %vm280_vm0 = vcmp.ge.s32.totalorder %v819_v21, 96  ;;  %vm281_vm1 = vcmp.lt.s32.totalorder %v819_v21, 100 }
  0x21   :  { %v532_v13 = vcombine.high %v796_v11, %v796_v11  ;;  %v651_v15 = vld [vmem:[%s864_s1 + $0x8] sm:$0xff]   ;;  %v652_v16 = vld [vmem:[%s864_s1 + $0x40] sm:$0xff]   ;;  %v531_v18 = vcombine.low %v796_v11, %v796_v11  ;;  %vm282_vm2 = vmand %vm280_vm0, %vm281_vm1  ;;  %vm412_vm4 = vcmp.lt.s32.totalorder %v819_v21, 32  ;;  %vm507_vm5 = vcmp.ge.s32.totalorder %v819_v21, 64 }
  0x22   :  { %560 = vmatpush3.bf16.msra.mxu0 %v641_v3  ;;  %v653_v17 = vld [vmem:[%s864_s1] sm:$0xff]   ;;  %v113_v32 = vld [vmem:[#allocation2 + $0xf8] sm:$0xff]  ;;  %v112_v33 = vld [vmem:[#allocation2 + $0xf0] sm:$0xff]  ;;  %vm508_vm6 = vcmp.lt.s32.totalorder %v819_v21, 74  ;;  %vm522_vm8 = vcmp.lt.s32.totalorder %v819_v21, 96 }
  0x23   :  { %561 = vmatprep.subr.bf16.mxu0 %v642_v4  ;;  %272 = vmatprep.mubr.bf16.mxu0 %v532_v13  ;;  %v825_v23 = vld [vmem:[%s867_s4] sm:$0x3]  ;;  %v111_v34 = vld [vmem:[#allocation2 + $0xe8] sm:$0xff]  ;;  %v109_v36 = vld [vmem:[#allocation2 + $0xd8] sm:$0xff] }
  0x24   :  { %v828_v25 = vrot.slane %v825_v23, %v135_v22  ;;  %294 = vmatprep.subr.mxu1 %v113_v32  ;;  %v110_v35 = vld [vmem:[#allocation2 + $0xe0] sm:$0xff]  ;;  %v108_v37 = vld [vmem:[#allocation2 + $0xd0] sm:$0xff]  ;;  %v107_v38 = vld [vmem:[#allocation2 + $0xc8] sm:$0xff] }
  0x25   :  { %295 = vmatpush1.msra.mxu1 %v112_v33  ;;  %v106_v39 = vld [vmem:[#allocation2 + $0xc0] sm:$0xff]  ;;  %v105_v40 = vld [vmem:[#allocation2 + $0xb8] sm:$0xff]  ;;  %v104_v41 = vld [vmem:[#allocation2 + $0xb0] sm:$0xff] }
  0x26   :  { %562 = vmatpush3.bf16.msra.mxu0 %v643_v5  ;;  %296 = vmatprep.subr.mxu1 %v111_v34  ;;  %v103_v42 = vld [vmem:[#allocation2 + $0xa8] sm:$0xff]  ;;  %v102_v43 = vld [vmem:[#allocation2 + $0xa0] sm:$0xff]  ;;  %v101_v44 = vld [vmem:[#allocation2 + $0x98] sm:$0xff] }
  0x27   :  { %563 = vmatprep.subr.bf16.mxu0 %v644_v6  ;;  %297 = vmatpush1.msra.mxu1 %v110_v35  ;;  %v100_v45 = vld [vmem:[#allocation2 + $0x90] sm:$0xff]  ;;  %v99_v46 = vld [vmem:[#allocation2 + $0x88] sm:$0xff]  ;;  %v98_v47 = vld [vmem:[#allocation2 + $0x80] sm:$0xff] }
  0x28   :  { %298 = vmatprep.subr.mxu1 %v109_v36  ;;  %v97_v52 = vld [vmem:[#allocation2 + $0x78] sm:$0xff]  ;;  %v96_v53 = vld [vmem:[#allocation2 + $0x70] sm:$0xff]  ;;  %v95_v54 = vld [vmem:[#allocation2 + $0x68] sm:$0xff] }
  0x29   :  { %299 = vmatpush1.msra.mxu1 %v108_v37  ;;  %v94_v55 = vld [vmem:[#allocation2 + $0x60] sm:$0xff]  ;;  %v93_v56 = vld [vmem:[#allocation2 + $0x58] sm:$0xff]  ;;  %v92_v58 = vld [vmem:[#allocation2 + $0x50] sm:$0xff] }
  0x2a   :  { %564 = vmatpush3.bf16.msra.mxu0 %v645_v7  ;;  %300 = vmatprep.subr.mxu1 %v107_v38  ;;  %v91_v59 = vld [vmem:[#allocation2 + $0x48] sm:$0xff]  ;;  %v90_v60 = vld [vmem:[#allocation2 + $0x40] sm:$0xff]  ;;  %v89_v61 = vld [vmem:[#allocation2 + $0x38] sm:$0xff] }
  0x2b   :  { %565 = vmatprep.subr.bf16.mxu0 %v646_v8  ;;  %301 = vmatpush1.msra.mxu1 %v106_v39  ;;  %v88_v62 = vld [vmem:[#allocation2 + $0x30] sm:$0xff]  ;;  %v87_v63 = vld [vmem:[#allocation2 + $0x28] sm:$0xff]  ;;  %v660_v13 = vld [vmem:[#allocation4 + $0x18] sm:$0xff]   ;;  %v417_v39 = vsub.s32 1, %v817_v20 }
  0x2c   :  { %302 = vmatprep.subr.mxu1 %v105_v40  ;;  %vm509_vm7 = vmand %vm507_vm5, %vm508_vm6 }
  0x2d   :  { %303 = vmatpush1.msra.mxu1 %v104_v41  ;;  %v418_v40 = vrot.slane %v825_v23, %v417_v39 }
  0x2e   :  { %566 = vmatpush3.bf16.msra.mxu0 %v647_v9  ;;  %304 = vmatprep.subr.mxu1 %v103_v42 }
  0x2f   :  { %567 = vmatprep.subr.bf16.mxu0 %v648_v10  ;;  %305 = vmatpush1.msra.mxu1 %v102_v43 }
  0x30   :  { %306 = vmatprep.subr.mxu1 %v101_v44 }
  0x31   :  { %307 = vmatpush1.msra.mxu1 %v100_v45 }
  0x32   :  { %568 = vmatpush3.bf16.msra.mxu0 %v649_v12  ;;  %308 = vmatprep.subr.mxu1 %v99_v46 }
  0x33   :  { %569 = vmatprep.subr.bf16.mxu0 %v650_v14  ;;  %309 = vmatpush1.msra.mxu1 %v98_v47 }
  0x34   :  { %310 = vmatprep.subr.mxu1 %v97_v52 }
  0x35   :  { %311 = vmatpush1.msra.mxu1 %v96_v53 }
  0x36   :  { %570 = vmatpush3.bf16.msra.mxu0 %v651_v15  ;;  %312 = vmatprep.subr.mxu1 %v95_v54 }
  0x37   :  { %571 = vmatprep.subr.bf16.mxu0 %v652_v16  ;;  %313 = vmatpush1.msra.mxu1 %v94_v55 }
  0x38   :  { %314 = vmatprep.subr.mxu1 %v93_v56 }
  0x39   :  { %315 = vmatpush1.msra.mxu1 %v92_v58 }
  0x3a   :  { %572 = vmatpush3.bf16.msra.mxu0 %v653_v17  ;;  %316 = vmatprep.subr.mxu1 %v91_v59 }
  0x3b   :  { %579 = vmatprep.subr.bf16.mxu0 %v638_v0  ;;  %317 = vmatpush1.msra.mxu1 %v90_v60  ;;  %v86_v0 = vld [vmem:[#allocation2 + $0x20] sm:$0xff] }
  0x3c   :  { %318 = vmatprep.subr.mxu1 %v89_v61 }
  0x3d   :  { %273 = vmatmul.mubr.bf16.vlgmr.msra.gmra.mxu0 %v531_v18  ;;  %319 = vmatpush1.msra.mxu1 %v88_v62 }
  0x3e   :  { %580 = vmatpush3.bf16.msra.mxu0 %v639_v1  ;;  %v85_v1 = vld [vmem:[#allocation2 + $0x18] sm:$0xff]  ;;  %320 = vmatprep.subr.mxu1 %v87_v63 }
  0x3f   :  { %581 = vmatprep.subr.bf16.mxu0 %v640_v2  ;;  %v84_v2 = vld [vmem:[#allocation2 + $0x10] sm:$0xff]  ;;  %321 = vmatpush1.msra.mxu1 %v86_v0 }
  0x40   :  { %322 = vmatprep.subr.mxu1 %v85_v1 }
  0x41   :  { %323 = vmatpush1.msra.mxu1 %v84_v2 }
  0x42   :  { %582 = vmatpush3.bf16.msra.mxu0 %v641_v3  ;;  %v83_v3 = vld [vmem:[#allocation2 + $0x8] sm:$0xff] }
  0x43   :  { %583 = vmatprep.subr.bf16.mxu0 %v642_v4  ;;  %v82_v4 = vld [vmem:[#allocation2] sm:$0xff]  ;;  %324 = vmatprep.subr.mxu1 %v83_v3 }
  0x44   :  { %325 = vmatpush1.msra.mxu1 %v82_v4 }
  0x45   :  { %610 = vmatprep.subr.bf16.mxu1 %v722_v57 }
  0x46   :  { %584 = vmatpush3.bf16.msra.mxu0 %v643_v5 }
  0x47   :  { %585 = vmatprep.subr.bf16.mxu0 %v644_v6 }
  0x4a   :  { %586 = vmatpush3.bf16.msra.mxu0 %v645_v7 }
  0x4b   :  { %587 = vmatprep.subr.bf16.mxu0 %v646_v8  ;;  %v656_v8 = vld [vmem:[#allocation4 + $0x38] sm:$0xff]  }
  0x4e   :  { %588 = vmatpush3.bf16.msra.mxu0 %v647_v9  ;;  %v657_v9 = vld [vmem:[#allocation4 + $0x30] sm:$0xff]  }
  0x4f   :  { %589 = vmatprep.subr.bf16.mxu0 %v648_v10  ;;  %v658_v10 = vld [vmem:[#allocation4 + $0x28] sm:$0xff]  }
  0x52   :  { %590 = vmatpush3.bf16.msra.mxu0 %v649_v12  ;;  %v659_v12 = vld [vmem:[#allocation4 + $0x20] sm:$0xff]  }
  0x53   :  { %591 = vmatprep.subr.bf16.mxu0 %v650_v14  ;;  %v365_v14 = vunpack.c.l.bf16 %v796_v11 }
  0x56   :  { %592 = vmatpush3.bf16.msra.mxu0 %v651_v15  ;;  %v366_v15 = vunpack.c.h.bf16 %v796_v11 }
  0x57   :  { %593 = vmatprep.subr.bf16.mxu0 %v652_v16 }
  0x5a   :  { %594 = vmatpush3.bf16.msra.mxu0 %v653_v17 }
  0xfd   :  { %v573_v24 = vpop.f32.mrf.mxu0 }
  0xff   :  { %v574_v26 = vpop.f32.mrf.mxu0 }
 0x100   :  { %v575_v27 = vadd.f32 %v574_v26, %v573_v24  ;;  %v661_v26 = vld [vmem:[#allocation4 + $0x10] sm:$0xff]  }
 0x101   :  { %v576_v28 = vpop.f32.mrf.mxu0 }
 0x102   :  { %v833_v29 = vadd.f32 %v575_v27, %v828_v25  ;;  %v662_v27 = vld [vmem:[#allocation4 + $0x8] sm:$0xff]   ;;  %v663_v28 = vld [vmem:[#allocation4] sm:$0xff]  }
 0x103   :  { %v577_v30 = vpop.f32.mrf.mxu0 }
 0x104   :  { %v283_v31 = vsel %vm282_vm2, %v833_v29, -1e+30  ;;  %v293_v35 = vmax.f32 %v833_v29, 0.0 }
 0x105   :  { %284 = vmax.xlane.f32.xlu0 %v283_v31 }
 0x18e   :  { %v285_v48 = vpop.xlane.xlu0 %284 }
 0x18f   :  { %v286_v49 = vsub.f32 %v283_v31, %v285_v48 }
 0x191   :  { %v287_v50 = vmul.f32 1.442695, %v286_v49 }
 0x193   :  { %664 = vpow2.f32 %v287_v50 }
 0x1a0   :  { %v665_v51 = vpop.eup %664 }
 0x1a1   :  { %289 = vadd.xlane.f32.xlu0 %v665_v51 }
 0x22a   :  { %v290_v5 = vpop.xlane.xlu0 %289 }
 0x22b   :  { %666 = vrcp.f32 %v290_v5 }
 0x238   :  { %v667_v6 = vpop.eup %666 }
 0x239   :  { %v838_v7 = vmul.f32 %v667_v6, %v665_v51 }
 0x23b   :  { %359 = vmatmul.mubr.f32.vlgmr.msra.gmra.mxu1 %v838_v7 }
 0x23c   :  { %611 = vmatpush3.bf16.msra.mxu1 %v656_v8  ;;  %626 = vmatprep.mubr.msk.bf16.mxu1 %vm723_vm3, %v722_v57 }
 0x23d   :  { %612 = vmatprep.subr.bf16.mxu1 %v722_v57 }
 0x240   :  { %613 = vmatpush3.bf16.msra.mxu1 %v657_v9 }
 0x241   :  { %614 = vmatprep.subr.bf16.mxu1 %v722_v57 }
 0x244   :  { %615 = vmatpush3.bf16.msra.mxu1 %v658_v10 }
 0x245   :  { %616 = vmatprep.subr.bf16.mxu1 %v722_v57 }
 0x248   :  { %617 = vmatpush3.bf16.msra.mxu1 %v659_v12 }
 0x249   :  { %618 = vmatprep.subr.bf16.mxu1 %v722_v57 }
 0x24c   :  { %619 = vmatpush3.bf16.msra.mxu1 %v660_v13 }
 0x24d   :  { %620 = vmatprep.subr.bf16.mxu1 %v722_v57 }
 0x250   :  { %621 = vmatpush3.bf16.msra.mxu1 %v661_v26 }
 0x251   :  { %622 = vmatprep.subr.bf16.mxu1 %v722_v57 }
 0x254   :  { %623 = vmatpush3.bf16.msra.mxu1 %v662_v27 }
 0x255   :  { %624 = vmatprep.subr.bf16.mxu1 %v722_v57 }
 0x258   :  { %625 = vmatpush3.bf16.msra.mxu1 %v663_v28 }
 0x2fb   :  { %v360_v16 = vpop.f32.mrf.mxu1 }
 0x2fc   :  { %v367_v17 = vmul.f32 %v365_v14, %v360_v16 }
 0x2fd   :  { %v362_v18 = vpop.f32.mrf.mxu1 }
 0x2fe   :  { %v368_v19 = vmul.f32 %v366_v15, %v362_v18  ;;  %v369_v24 = vpack.c.bf16 %v367_v17, %v367_v17 }
 0x300   :  { %v370_v22 = vpack.c.bf16 %v368_v19, %v368_v19 }
 0x302   :  { %403 = vmatprep.mubr.bf16.mxu0 %v370_v22 }
 0x303   :  { %404 = vmatmul.mubr.bf16.vlgmr.msra.gmra.mxu0 %v369_v24 }
 0x3c3   :  { %v595_v11 = vpop.f32.mrf.mxu0 }
 0x3c5   :  { %v596_v30 = vpop.f32.mrf.mxu0 }
 0x3c6   :  { %v597_v31 = vadd.f32 %v596_v30, %v595_v11 }
 0x3c7   :  { %v598_v32 = vpop.f32.mrf.mxu0 }
 0x3c8   :  { %v406_v33 = vadd.f32 %v597_v31, %v828_v25 }
 0x3c9   :  { %v599_v34 = vpop.f32.mrf.mxu0 }
 0x3ca   :  { %v411_v36 = vmax.f32 %v406_v33, 0.0 }
 0x3cc   :  { %v413_v37 = vsel %vm412_vm4, %v293_v35, %v411_v36 }
 0x3cd   :  { %v414_v38 = vpack.c.bf16 %v413_v37, %v413_v37 }
 0x3cf   :  { %627 = vmatmul.mubr.bf16.vlgmr.msra.gmra.mxu1 %v414_v38 }
 0x48f   :  { %v501_v41 = vpop.f32.mrf.mxu1 }
 0x490   :  { %v502_v25 = vadd.f32 %v501_v41, %v418_v40 }
 0x491   :  { %v628_v42 = vpop.f32.mrf.mxu1 }
 0x492   :  { %v510_v43 = vsel %vm509_vm7, %v502_v25, -1e+30 }
 0x493   :  { %511 = vmax.xlane.f32.xlu1 %v510_v43  ;;  %v504_v44 = vpop.f32.mrf.mxu1 }
 0x495   :  { %v629_v29 = vpop.f32.mrf.mxu1 }
 0x51c   :  { %v512_v45 = vpop.xlane.xlu1 %511 }
 0x51d   :  { %v513_v46 = vsub.f32 %v510_v43, %v512_v45 }
 0x51f   :  { %v514_v47 = vmul.f32 1.442695, %v513_v46 }
 0x521   :  { %668 = vpow2.f32 %v514_v47 }
 0x52e   :  { %v669_v48 = vpop.eup %668 }
 0x52f   :  { %516 = vadd.xlane.f32.xlu1 %v669_v48 }
 0x5b8   :  { %v517_v20 = vpop.xlane.xlu1 %516 }
 0x5b9   :  { %670 = vlog2.f32 %v517_v20 }
 0x5c6   :  { %v671_v23 = vpop.eup %670 }
 0x5c7   :  { %v519_v49 = vmul.f32 0.6931472, %v671_v23 }
 0x5c9   :  { %v520_v50 = vadd.f32 %v519_v49, %v512_v45 }
 0x5cb   :  { %v521_v51 = vsub.f32 %v502_v25, %v520_v50 }
 0x5cd   :  { %v523_v52 = vsel %vm522_vm8, %v521_v51, %v838_v7 }
 0x5ce   :  { %524 = vst [vmem:[%s868_s5] sm:$0xff] %v523_v52 }
 0x5cf   :  { %529 = vsyncpa [#allocation3], 1 }
 0x5d0   :  { %530 = vsyncpa [#allocation5], 1 }

</bundles_post_ra>
